<compile_context>
chip_gen: v6e
topology: v6e:2x2x1
jax: 0.10.0
libtpu: 0.0.40
codegen_flags: <defaults>
</compile_context>

<pallas_src>
import functools

import jax
import jax.numpy as jnp
from jax import lax
from jax.experimental import pallas as pl
from jax.experimental.pallas import tpu as pltpu


def _round_up(x, m):
    return (x + m - 1) // m * m


def _actor_kernel(log_std_min, log_std_max, feature_dim, hidden_dim, action_dim, n_out_pad,
                  obs_ref, w1_ref, w2_ref, w3_ref, w4_ref, vec_ref, out_ref):
    # Parameter vectors packed into one (8, slab_w) f32 slab:
    #   row 0: b1    row 1: ln_gamma   row 2: ln_beta
    #   row 3: b2    row 4: b3         row 5: b4 (first n_out_pad lanes)
    b1 = vec_ref[0:1, :feature_dim]
    ln_g = vec_ref[1:2, :feature_dim]
    ln_b = vec_ref[2:3, :feature_dim]
    b2 = vec_ref[3:4, :hidden_dim]
    b3 = vec_ref[4:5, :hidden_dim]
    b4 = vec_ref[5:6, :n_out_pad]          # explicit width: slab may be wider than out tile

    # obs arrives f32; cast to bf16 in-kernel (no standalone HBM convert pass in the wrapper).
    x = obs_ref[...].astype(jnp.bfloat16)

    # Linear(repr_dim, feature_dim): bf16 MXU matmul, f32 accumulation.
    h = jnp.dot(x, w1_ref[...], preferred_element_type=jnp.float32) + b1

    # LayerNorm(feature_dim), eps=1e-5 — two-moment form (back-to-back XLU reductions),
    # variance clamped at 0 to guard against f32 cancellation going slightly negative.
    mean = jnp.mean(h, axis=-1, keepdims=True)
    mean_sq = jnp.mean(h * h, axis=-1, keepdims=True)
    var = jnp.maximum(mean_sq - mean * mean, 0.0)
    h = (h - mean) * lax.rsqrt(var + 1e-5)
    h = h * ln_g + ln_b

    # Tanh
    h = jnp.tanh(h)

    # Linear(feature_dim, hidden_dim) + ReLU
    h = jnp.dot(h.astype(jnp.bfloat16), w2_ref[...],
                preferred_element_type=jnp.float32) + b2
    h = jnp.maximum(h, 0.0)

    # Linear(hidden_dim, hidden_dim) + ReLU
    h = jnp.dot(h.astype(jnp.bfloat16), w3_ref[...],
                preferred_element_type=jnp.float32) + b3
    h = jnp.maximum(h, 0.0)

    # Fused final Linear(hidden_dim, 2*action_dim) padded to a lane-dense 128-wide tile:
    #   lanes [0, action_dim)            -> mu
    #   lanes [action_dim, 2*action_dim) -> log_std -> clip -> exp -> std
    y = jnp.dot(h.astype(jnp.bfloat16), w4_ref[...],
                preferred_element_type=jnp.float32) + b4

    lane = lax.broadcasted_iota(jnp.int32, y.shape, 1)
    # exp over all 128 lanes is EUP-slot filler hidden under MXU/DMA slack (review #7).
    std = jnp.exp(jnp.clip(y, log_std_min, log_std_max))
    out_ref[...] = jnp.where(lane < action_dim, y, std).astype(out_ref.dtype)


def _choose_tile(B, tile_b):
    """Batch tile: multiple of 16 (bf16 sublanes) when possible; >=2 grid steps for v7x."""
    if B >= 64:
        # Split the batch so both v7x TensorCores get work (>= 2 grid steps).
        return min(tile_b, _round_up(pl.cdiv(B, 2), 16))
    if B >= 16:
        return min(tile_b, _round_up(B, 16))
    return _round_up(max(B, 1), 8)


def non_categorical_actor_forward(obs, params, log_std_bounds, action_dim, *, tile_b=1024):
    """Returns (mu, std_pred) — the parameters of the policy distribution — as f32."""
    B, repr_dim = obs.shape
    feature_dim = params["w1"].shape[1]
    hidden_dim = params["w2"].shape[1]
    n_out_pad = params["w4"].shape[1]
    slab_w = params["vec"].shape[1]
    log_std_min, log_std_max = log_std_bounds

    tb = _choose_tile(B, tile_b)
    grid = (pl.cdiv(B, tb),)

    kernel = functools.partial(
        _actor_kernel,
        float(log_std_min), float(log_std_max),
        feature_dim, hidden_dim, action_dim, n_out_pad)

    out = pl.pallas_call(
        kernel,
        # bf16 output halves the dominant (padded, lane-dense) HBM writeback stream.
        out_shape=jax.ShapeDtypeStruct((B, n_out_pad), jnp.bfloat16),
        grid=grid,
        in_specs=[
            pl.BlockSpec((tb, repr_dim), lambda i: (i, 0)),             # obs (f32, tiled on batch)
            pl.BlockSpec((repr_dim, feature_dim), lambda i: (0, 0)),    # w1 (bf16, resident)
            pl.BlockSpec((feature_dim, hidden_dim), lambda i: (0, 0)),  # w2
            pl.BlockSpec((hidden_dim, hidden_dim), lambda i: (0, 0)),   # w3
            pl.BlockSpec((hidden_dim, n_out_pad), lambda i: (0, 0)),    # w4 (padded, fused)
            pl.BlockSpec((8, slab_w), lambda i: (0, 0)),                # packed bias/LN slab (f32)
        ],
        out_specs=pl.BlockSpec((tb, n_out_pad), lambda i: (i, 0)),
        compiler_params=pltpu.CompilerParams(
            dimension_semantics=("parallel",),
            vmem_limit_bytes=32 * 1024 * 1024),
    )(obs, params["w1"], params["w2"], params["w3"], params["w4"], params["vec"])

    mu = out[:, :action_dim].astype(jnp.float32)
    std = out[:, action_dim:2 * action_dim].astype(jnp.float32)
    return mu, std


def init_params(key, repr_dim, feature_dim, hidden_dim, action_dim):
    """Deterministic synthetic parameters (stand-in for utils.weight_init)."""
    ks = jax.random.split(key, 4)

    def lin(k, fan_in, fan_out):
        scale = 1.0 / jnp.sqrt(fan_in)
        kw, kb = jax.random.split(k)
        w = jax.random.uniform(kw, (fan_in, fan_out), jnp.float32, -scale, scale)
        b = jax.random.uniform(kb, (fan_out,), jnp.float32, -scale, scale)
        return w, b

    w1, b1 = lin(ks[0], repr_dim, feature_dim)
    w2, b2 = lin(ks[1], feature_dim, hidden_dim)
    w3, b3 = lin(ks[2], hidden_dim, hidden_dim)
    w4, b4 = lin(ks[3], hidden_dim, 2 * action_dim)   # final layer kept fused

    n_out = 2 * action_dim
    n_out_pad = _round_up(n_out, 128)                 # lane-dense output tile
    slab_w = _round_up(max(feature_dim, hidden_dim, n_out_pad), 128)

    w4_pad = jnp.zeros((hidden_dim, n_out_pad), jnp.float32).at[:, :n_out].set(w4)

    vec = jnp.zeros((8, slab_w), jnp.float32)
    vec = vec.at[0, :feature_dim].set(b1)
    vec = vec.at[1, :feature_dim].set(jnp.ones((feature_dim,), jnp.float32))  # LN gamma
    # row 2: LN beta stays zero
    vec = vec.at[3, :hidden_dim].set(b2)
    vec = vec.at[4, :hidden_dim].set(b3)
    vec = vec.at[5, :n_out].set(b4)

    return dict(
        w1=w1.astype(jnp.bfloat16),
        w2=w2.astype(jnp.bfloat16),
        w3=w3.astype(jnp.bfloat16),
        w4=w4_pad.astype(jnp.bfloat16),
        vec=vec,
    )


def reference_forward(obs, params, log_std_bounds, feature_dim, hidden_dim, action_dim):
    """Pure-JAX reference (same bf16-matmul / f32-accumulate numerics) for checking."""
    vec = params["vec"]
    b1 = vec[0, :feature_dim]
    ln_g = vec[1, :feature_dim]
    ln_b = vec[2, :feature_dim]
    b2 = vec[3, :hidden_dim]
    b3 = vec[4, :hidden_dim]
    b4 = vec[5, :2 * action_dim]

    h = jnp.dot(obs.astype(jnp.bfloat16), params["w1"],
                preferred_element_type=jnp.float32) + b1
    mean = h.mean(-1, keepdims=True)
    var = ((h - mean) ** 2).mean(-1, keepdims=True)
    h = (h - mean) / jnp.sqrt(var + 1e-5)
    h = h * ln_g + ln_b
    h = jnp.tanh(h)
    h = jnp.maximum(jnp.dot(h.astype(jnp.bfloat16), params["w2"],
                            preferred_element_type=jnp.float32) + b2, 0.0)
    h = jnp.maximum(jnp.dot(h.astype(jnp.bfloat16), params["w3"],
                            preferred_element_type=jnp.float32) + b3, 0.0)
    w4 = params["w4"][:, :2 * action_dim]
    y = jnp.dot(h.astype(jnp.bfloat16), w4, preferred_element_type=jnp.float32) + b4
    mu = y[:, :action_dim]
    log_std = jnp.clip(y[:, action_dim:], log_std_bounds[0], log_std_bounds[1])
    return mu, jnp.exp(log_std)


if __name__ == "__main__":
    # Small shapes consistent with the module's constructor.
    repr_dim = 32
    feature_dim = 64
    hidden_dim = 32
    action_shape = (4,)
    action_dim = action_shape[0]
    log_std_bounds = (-10.0, 2.0)
    policy_distribution = "tanh_gaussian"  # distribution object itself not materialized

    key = jax.random.PRNGKey(0)
    k_obs, k_par, k_obs2 = jax.random.split(key, 3)
    params = init_params(k_par, repr_dim, feature_dim, hidden_dim, action_dim)

    # bf16 output + bf16 matmul path -> compare with a loose-but-safe tolerance.
    tol = dict(atol=2e-2, rtol=2e-2)

    # Case 1: tiny batch (single grid step).
    B = 8
    obs = jax.random.normal(k_obs, (B, repr_dim), jnp.float32)
    mu, std = non_categorical_actor_forward(obs, params, log_std_bounds, action_dim)
    jax.block_until_ready((mu, std))
    mu_ref, std_ref = reference_forward(obs, params, log_std_bounds,
                                        feature_dim, hidden_dim, action_dim)
    assert mu.shape == (B, action_dim) and std.shape == (B, action_dim)
    assert jnp.allclose(mu, mu_ref, **tol)
    assert jnp.allclose(std, std_ref, **tol)
    assert bool(jnp.all(std > 0))

    # Case 2: larger batch — exercises the multi-step (v7x two-TensorCore) grid path.
    B2 = 256
    obs2 = jax.random.normal(k_obs2, (B2, repr_dim), jnp.float32)
    mu2, std2 = non_categorical_actor_forward(obs2, params, log_std_bounds, action_dim)
    jax.block_until_ready((mu2, std2))
    mu2_ref, std2_ref = reference_forward(obs2, params, log_std_bounds,
                                          feature_dim, hidden_dim, action_dim)
    assert mu2.shape == (B2, action_dim) and std2.shape == (B2, action_dim)
    assert jnp.allclose(mu2, mu2_ref, **tol)
    assert jnp.allclose(std2, std2_ref, **tol)
    assert bool(jnp.all(std2 > 0))

    print("KERNEL_OK")
</pallas_src>

<mosaic_0001>
module attributes {stable_mosaic.version = 11 : i64} {
  func.func @_actor_kernel(%arg0: i32, %arg1: memref<8x32xf32, #tpu.memory_space<vmem>>, %arg2: memref<32x64xbf16, #tpu.memory_space<vmem>>, %arg3: memref<64x32xbf16, #tpu.memory_space<vmem>>, %arg4: memref<32x32xbf16, #tpu.memory_space<vmem>>, %arg5: memref<32x128xbf16, #tpu.memory_space<vmem>>, %arg6: memref<8x128xf32, #tpu.memory_space<vmem>>, %arg7: memref<8x128xbf16, #tpu.memory_space<vmem>>) attributes {dimension_semantics = [#tpu.dimension_semantics<parallel>], iteration_bounds = array<i64: 1>, scalar_prefetch = 0 : i64, scratch_operands = 0 : i64, tpu.core_type = #tpu.core_type<tc>, window_params = [{transform_indices = @transform_0, window_bounds = array<i64: 8, 32>}, {pipeline_mode = #tpu.pipeline_mode<synchronous>, transform_indices = @transform_1, window_bounds = array<i64: 32, 64>}, {pipeline_mode = #tpu.pipeline_mode<synchronous>, transform_indices = @transform_2, window_bounds = array<i64: 64, 32>}, {pipeline_mode = #tpu.pipeline_mode<synchronous>, transform_indices = @transform_3, window_bounds = array<i64: 32, 32>}, {pipeline_mode = #tpu.pipeline_mode<synchronous>, transform_indices = @transform_4, window_bounds = array<i64: 32, 128>}, {pipeline_mode = #tpu.pipeline_mode<synchronous>, transform_indices = @transform_5, window_bounds = array<i64: 8, 128>}, {transform_indices = @transform_6, window_bounds = array<i64: 8, 128>}]} {
    %c0 = arith.constant 0 : index
    %c0_0 = arith.constant 0 : index
    %0 = vector.load %arg6[%c0, %c0_0] : memref<8x128xf32, #tpu.memory_space<vmem>>, vector<1x64xf32>
    %c1 = arith.constant 1 : index
    %c0_1 = arith.constant 0 : index
    %1 = vector.load %arg6[%c1, %c0_1] : memref<8x128xf32, #tpu.memory_space<vmem>>, vector<1x64xf32>
    %c2 = arith.constant 2 : index
    %c0_2 = arith.constant 0 : index
    %2 = vector.load %arg6[%c2, %c0_2] : memref<8x128xf32, #tpu.memory_space<vmem>>, vector<1x64xf32>
    %c3 = arith.constant 3 : index
    %c0_3 = arith.constant 0 : index
    %3 = vector.load %arg6[%c3, %c0_3] : memref<8x128xf32, #tpu.memory_space<vmem>>, vector<1x32xf32>
    %c4 = arith.constant 4 : index
    %c0_4 = arith.constant 0 : index
    %4 = vector.load %arg6[%c4, %c0_4] : memref<8x128xf32, #tpu.memory_space<vmem>>, vector<1x32xf32>
    %c5 = arith.constant 5 : index
    %c0_5 = arith.constant 0 : index
    %5 = vector.load %arg6[%c5, %c0_5] : memref<8x128xf32, #tpu.memory_space<vmem>>, vector<1x128xf32>
    %c0_6 = arith.constant 0 : index
    %c0_7 = arith.constant 0 : index
    %6 = vector.load %arg1[%c0_6, %c0_7] : memref<8x32xf32, #tpu.memory_space<vmem>>, vector<8x32xf32>
    %7 = arith.truncf %6 : vector<8x32xf32> to vector<8x32xbf16>
    %c0_8 = arith.constant 0 : index
    %c0_9 = arith.constant 0 : index
    %8 = vector.load %arg2[%c0_8, %c0_9] : memref<32x64xbf16, #tpu.memory_space<vmem>>, vector<32x64xbf16>
    %cst = arith.constant dense<0.000000e+00> : vector<8x64xf32>
    %9 = tpu.matmul %7, %8, %cst {dimension_numbers = #tpu.dot_dimension_numbers<[1], [0], [0], [1], [0, 0, 1, 1], [], []>} : vector<8x32xbf16>, vector<32x64xbf16>, vector<8x64xf32> -> vector<8x64xf32>
    %10 = vector.broadcast %0 : vector<1x64xf32> to vector<8x64xf32>
    %11 = arith.addf %9, %10 : vector<8x64xf32>
    %cst_10 = arith.constant dense<0.000000e+00> : vector<8xf32>
    %12 = vector.multi_reduction <add>, %11, %cst_10 [1] : vector<8x64xf32> to vector<8xf32>
    %13 = vector.shape_cast %12 : vector<8xf32> to vector<8x1xf32>
    %cst_11 = arith.constant 6.400000e+01 : f32
    %14 = vector.broadcast %cst_11 : f32 to vector<8x1xf32>
    %15 = arith.divf %13, %14 : vector<8x1xf32>
    %16 = arith.mulf %11, %11 : vector<8x64xf32>
    %cst_12 = arith.constant dense<0.000000e+00> : vector<8xf32>
    %17 = vector.multi_reduction <add>, %16, %cst_12 [1] : vector<8x64xf32> to vector<8xf32>
    %18 = vector.shape_cast %17 : vector<8xf32> to vector<8x1xf32>
    %cst_13 = arith.constant 6.400000e+01 : f32
    %19 = vector.broadcast %cst_13 : f32 to vector<8x1xf32>
    %20 = arith.divf %18, %19 : vector<8x1xf32>
    %21 = arith.mulf %15, %15 : vector<8x1xf32>
    %22 = arith.subf %20, %21 : vector<8x1xf32>
    %cst_14 = arith.constant 0.000000e+00 : f32
    %23 = vector.broadcast %cst_14 : f32 to vector<8x1xf32>
    %24 = arith.maximumf %22, %23 : vector<8x1xf32>
    %25 = vector.broadcast %15 : vector<8x1xf32> to vector<8x64xf32>
    %26 = arith.subf %11, %25 : vector<8x64xf32>
    %cst_15 = arith.constant 9.99999974E-6 : f32
    %27 = vector.broadcast %cst_15 : f32 to vector<8x1xf32>
    %28 = arith.addf %24, %27 : vector<8x1xf32>
    %29 = math.rsqrt %28 : vector<8x1xf32>
    %30 = vector.broadcast %29 : vector<8x1xf32> to vector<8x64xf32>
    %31 = arith.mulf %26, %30 : vector<8x64xf32>
    %32 = vector.broadcast %1 : vector<1x64xf32> to vector<8x64xf32>
    %33 = arith.mulf %31, %32 : vector<8x64xf32>
    %34 = vector.broadcast %2 : vector<1x64xf32> to vector<8x64xf32>
    %35 = arith.addf %33, %34 : vector<8x64xf32>
    %36 = math.tanh %35 : vector<8x64xf32>
    %37 = arith.truncf %36 : vector<8x64xf32> to vector<8x64xbf16>
    %c0_16 = arith.constant 0 : index
    %c0_17 = arith.constant 0 : index
    %38 = vector.load %arg3[%c0_16, %c0_17] : memref<64x32xbf16, #tpu.memory_space<vmem>>, vector<64x32xbf16>
    %cst_18 = arith.constant dense<0.000000e+00> : vector<8x32xf32>
    %39 = tpu.matmul %37, %38, %cst_18 {dimension_numbers = #tpu.dot_dimension_numbers<[1], [0], [0], [1], [0, 0, 1, 1], [], []>} : vector<8x64xbf16>, vector<64x32xbf16>, vector<8x32xf32> -> vector<8x32xf32>
    %40 = vector.broadcast %3 : vector<1x32xf32> to vector<8x32xf32>
    %41 = arith.addf %39, %40 : vector<8x32xf32>
    %cst_19 = arith.constant 0.000000e+00 : f32
    %42 = vector.broadcast %cst_19 : f32 to vector<8x32xf32>
    %43 = arith.maximumf %41, %42 : vector<8x32xf32>
    %44 = arith.truncf %43 : vector<8x32xf32> to vector<8x32xbf16>
    %c0_20 = arith.constant 0 : index
    %c0_21 = arith.constant 0 : index
    %45 = vector.load %arg4[%c0_20, %c0_21] : memref<32x32xbf16, #tpu.memory_space<vmem>>, vector<32x32xbf16>
    %cst_22 = arith.constant dense<0.000000e+00> : vector<8x32xf32>
    %46 = tpu.matmul %44, %45, %cst_22 {dimension_numbers = #tpu.dot_dimension_numbers<[1], [0], [0], [1], [0, 0, 1, 1], [], []>} : vector<8x32xbf16>, vector<32x32xbf16>, vector<8x32xf32> -> vector<8x32xf32>
    %47 = vector.broadcast %4 : vector<1x32xf32> to vector<8x32xf32>
    %48 = arith.addf %46, %47 : vector<8x32xf32>
    %cst_23 = arith.constant 0.000000e+00 : f32
    %49 = vector.broadcast %cst_23 : f32 to vector<8x32xf32>
    %50 = arith.maximumf %48, %49 : vector<8x32xf32>
    %51 = arith.truncf %50 : vector<8x32xf32> to vector<8x32xbf16>
    %c0_24 = arith.constant 0 : index
    %c0_25 = arith.constant 0 : index
    %52 = vector.load %arg5[%c0_24, %c0_25] : memref<32x128xbf16, #tpu.memory_space<vmem>>, vector<32x128xbf16>
    %cst_26 = arith.constant dense<0.000000e+00> : vector<8x128xf32>
    %53 = tpu.matmul %51, %52, %cst_26 {dimension_numbers = #tpu.dot_dimension_numbers<[1], [0], [0], [1], [0, 0, 1, 1], [], []>} : vector<8x32xbf16>, vector<32x128xbf16>, vector<8x128xf32> -> vector<8x128xf32>
    %54 = vector.broadcast %5 : vector<1x128xf32> to vector<8x128xf32>
    %55 = arith.addf %53, %54 : vector<8x128xf32>
    %56 = tpu.iota {dimensions = array<i32: 1>} : vector<8x128xi32>
    %cst_27 = arith.constant -1.000000e+01 : f32
    %cst_28 = arith.constant 2.000000e+00 : f32
    %57 = vector.broadcast %cst_27 : f32 to vector<8x128xf32>
    %58 = arith.maximumf %57, %55 : vector<8x128xf32>
    %59 = vector.broadcast %cst_28 : f32 to vector<8x128xf32>
    %60 = arith.minimumf %59, %58 : vector<8x128xf32>
    %61 = math.exp %60 : vector<8x128xf32>
    %c4_i32 = arith.constant 4 : i32
    %62 = vector.broadcast %c4_i32 : i32 to vector<8x128xi32>
    %63 = arith.cmpi slt, %56, %62 : vector<8x128xi32>
    %64 = arith.select %63, %55, %61 : vector<8x128xi1>, vector<8x128xf32>
    %65 = arith.truncf %64 : vector<8x128xf32> to vector<8x128xbf16>
    %c0_29 = arith.constant 0 : index
    %c0_30 = arith.constant 0 : index
    %66 = vector.load %arg7[%c0_29, %c0_30] : memref<8x128xbf16, #tpu.memory_space<vmem>>, vector<8x128xbf16>
    tpu.vector_store %arg7[%c0_29, %c0_30], %65 {strides = array<i32>} : memref<8x128xbf16, #tpu.memory_space<vmem>>, vector<8x128xbf16>,
    return
  }
  func.func @transform_0(%arg0: i32) -> (i32, i32) {
    %c0_i32 = arith.constant 0 : i32
    %c0_i32_0 = arith.constant 0 : i32
    return %arg0, %c0_i32 : i32, i32
  }
  func.func @transform_1(%arg0: i32) -> (i32, i32) {
    %c0_i32 = arith.constant 0 : i32
    %c0_i32_0 = arith.constant 0 : i32
    %c0_i32_1 = arith.constant 0 : i32
    return %c0_i32, %c0_i32_0 : i32, i32
  }
  func.func @transform_2(%arg0: i32) -> (i32, i32) {
    %c0_i32 = arith.constant 0 : i32
    %c0_i32_0 = arith.constant 0 : i32
    %c0_i32_1 = arith.constant 0 : i32
    return %c0_i32, %c0_i32_0 : i32, i32
  }
  func.func @transform_3(%arg0: i32) -> (i32, i32) {
    %c0_i32 = arith.constant 0 : i32
    %c0_i32_0 = arith.constant 0 : i32
    %c0_i32_1 = arith.constant 0 : i32
    return %c0_i32, %c0_i32_0 : i32, i32
  }
  func.func @transform_4(%arg0: i32) -> (i32, i32) {
    %c0_i32 = arith.constant 0 : i32
    %c0_i32_0 = arith.constant 0 : i32
    %c0_i32_1 = arith.constant 0 : i32
    return %c0_i32, %c0_i32_0 : i32, i32
  }
  func.func @transform_5(%arg0: i32) -> (i32, i32) {
    %c0_i32 = arith.constant 0 : i32
    %c0_i32_0 = arith.constant 0 : i32
    %c0_i32_1 = arith.constant 0 : i32
    return %c0_i32, %c0_i32_0 : i32, i32
  }
  func.func @transform_6(%arg0: i32) -> (i32, i32) {
    %c0_i32 = arith.constant 0 : i32
    %c0_i32_0 = arith.constant 0 : i32
    return %arg0, %c0_i32 : i32, i32
  }
}

</mosaic_0001>

<bundles_post_ra>
// kernel: tpu_custom_call.1
= control target key start
LH: loop header
LB: loop body
LE: loop exit
PB: predicated region body
PF: predicated region fallthrough
CT: control target
= control target key end

     0   :  { %11 = vsyncpa [#allocation3], 0  ;;  %s624_s0 = inlined_call_operand.hbm [shape: f32[8,32], index: 0, kind: input, shape index: {}]   ;;  %s625_s1 = inlined_call_operand.vmem [shape: bf16[32,64], index: 1, kind: input, shape index: {}]   ;;  %s626_s2 = inlined_call_operand.vmem [shape: bf16[64,32], index: 2, kind: input, shape index: {}]   ;;  %s627_s3 = inlined_call_operand.vmem [shape: bf16[32,32], index: 3, kind: input, shape index: {}]   ;;  %s628_s4 = inlined_call_operand.vmem [shape: bf16[32,128], index: 4, kind: input, shape index: {}]   ;;  %s629_s5 = inlined_call_operand.vmem [shape: f32[8,128], index: 5, kind: input, shape index: {}]   ;;  %s630_s6 = inlined_call_operand.hbm [shape: bf16[8,128], index: 6, kind: output, shape index: {}]  }
   0x1   :  { %12 = vsyncpa [#allocation4], 0  ;;  %s507_s21 = smov [#allocation2]  }
   0x2   :  { %s19_s22 = sshll.u32 %s507_s21, 4  ;;  %s20_s22 = int_to_ptr.vmem [resolvable:$true] %s19_s22 }
   0x3   :  { %s471_s23 = scalar_lea.vmem %s20_s22, 128  ;;  %p476_p1 = scmp.lt.s32.totalorder %s20_s22, %s20_s22 }
   0x4   :  { %p472_p0 = scmp.ne.s32.totalorder %s20_s22, %s471_s23  ;;  %p477_p2 = scmp.lt.s32.totalorder %s471_s23, %s471_s23 }
   0x6   :  { %p478_p3 = por %p477_p2, %p476_p1 }
   0x8   :  { %p479_p4 = pnand %p478_p3, %p472_p0 }
   0xa   :  { %482 = shalt.err (!%p479_p4)
}
   0xb   :  { %22 = dma.hbm_to_vmem [thread:$0]  %s624_s0, 128, %s20_s22, [#allocation3]  }
   0xc   :  { %503 = dma.done.wait [#allocation3], 128  }
   0xd   :  { %504 = vsyncadd [#allocation3], 4294967168  ;;  %v508_v0 = vmov 0.0   ;;  %vm509_vm0 = vmmov 0   ;;  %v447_v1 = vld [vmem:[%s625_s1 + $0x8] sm:$0xff]   ;;  %v448_v2 = vld [vmem:[%s625_s1] sm:$0xff]  }
   0xe   :  { %407 = vmatprep.subr.bf16.mxu0 %v508_v0  ;;  %411 = vmatprep.mubr.msk.bf16.mxu0 %vm509_vm0, %v508_v0  ;;  %v43_v3 = vld [vmem:[#allocation2] sm:$0xff]  ;;  %vm65_vm1 = vcmask 261120   ;;  %vm109_vm2 = vcmask 523264   ;;  %v449_v14 = vld [vmem:[%s626_s2 + $0x18] sm:$0xff]   ;;  %v450_v15 = vld [vmem:[%s626_s2 + $0x10] sm:$0xff]  }
   0xf   :  { %415 = vmatprep.subr.bf16.mxu1 %v508_v0  ;;  %423 = vmatprep.mubr.msk.bf16.mxu1 %vm509_vm0, %v508_v0  ;;  %v44_v4 = vpack.c.bf16 %v43_v3, %v43_v3  ;;  %v373_v5 = vld [vmem:[%s629_s5] ss:$0 sm:$0xff]  ;;  %v451_v16 = vld [vmem:[%s626_s2 + $0x8] sm:$0xff]   ;;  %v377_v29 = vld [vmem:[%s629_s5 + $0x1] ss:$0 sm:$0xff] }
  0x10   :  { %408 = vmatpush3.bf16.msra.mxu0 %v447_v1  ;;  %416 = vmatpush3.bf16.msra.mxu1 %v449_v14  ;;  %v452_v17 = vld [vmem:[%s626_s2] sm:$0xff]   ;;  %v453_v18 = vld [vmem:[%s627_s3 + $0x8] sm:$0xff]  }
  0x11   :  { %409 = vmatprep.subr.bf16.mxu0 %v508_v0  ;;  %417 = vmatprep.subr.bf16.mxu1 %v508_v0  ;;  %v378_v31 = vld [vmem:[%s629_s5 + $0x2] ss:$0 sm:$0xff]  ;;  %v379_v37 = vld [vmem:[%s629_s5 + $0x3] ss:$0 sm:$0xff]  ;;  %v455_v43 = vld [vmem:[%s628_s4 + $0x8] sm:$0xff]  }
  0x12   :  { %v454_v36 = vld [vmem:[%s627_s3] sm:$0xff]  }
  0x13   :  { %v456_v46 = vld [vmem:[%s628_s4] sm:$0xff]   ;;  %s510_s4 = smov [#allocation5]  }
  0x14   :  { %410 = vmatpush3.bf16.msra.mxu0 %v448_v2  ;;  %418 = vmatpush3.bf16.msra.mxu1 %v450_v15  ;;  %v385_v47 = vld [vmem:[%s629_s5 + $0x4] ss:$0 sm:$0xff]  ;;  %v389_v55 = vld [vmem:[%s629_s5 + $0x5] ss:$0 sm:$0xff]  ;;  %s364_s29 = sshll.u32 %s510_s4, 4  ;;  %s365_s29 = int_to_ptr.vmem [resolvable:$true] %s364_s29 }
  0x15   :  { %427 = vmatprep.subr.bf16.mxu0 %v508_v0  ;;  %419 = vmatprep.subr.bf16.mxu1 %v508_v0  ;;  %s483_s5 = scalar_lea.vmem %s365_s29, 64  ;;  %p488_p6 = scmp.lt.s32.totalorder %s365_s29, %s365_s29 }
  0x16   :  { %p484_p5 = scmp.ne.s32.totalorder %s365_s29, %s483_s5  ;;  %p489_p7 = scmp.lt.s32.totalorder %s483_s5, %s483_s5 }
  0x17   :  { %412 = vmatmul.mubr.msk.bf16.vlgmr.msra.gmra.mxu0 %vm65_vm1, %v44_v4 }
  0x18   :  { %431 = vmatprep.mubr.msk.bf16.mxu0 %vm509_vm0, %v508_v0  ;;  %420 = vmatpush3.bf16.msra.mxu1 %v451_v16  ;;  %p490_p8 = por %p489_p7, %p488_p6 }
  0x19   :  { %421 = vmatprep.subr.bf16.mxu1 %v508_v0  ;;  %428 = vmatpush3.bf16.msra.mxu0 %v453_v18 }
  0x1a   :  { %429 = vmatprep.subr.bf16.mxu0 %v508_v0  ;;  %p491_p9 = pnand %p490_p8, %p484_p5 }
  0x1c   :  { %422 = vmatpush3.bf16.msra.mxu1 %v452_v17 }
  0x1d   :  { %430 = vmatpush3.bf16.msra.mxu0 %v454_v36 }
  0x1e   :  { %435 = vmatprep.subr.bf16.mxu0 %v508_v0 }
  0xd7   :  { %v103_v6 = vpop.f32.mrf.mxu0 }
  0xd8   :  { %v104_v7 = vadd.f32 %v373_v5, %v103_v6 }
  0xd9   :  { %v413_v8 = vpop.f32.mrf.mxu0 }
  0xda   :  { %v110_v9 = vsel %vm109_vm2, %v104_v7, 0.0  ;;  %v115_v10 = vmul.f32 %v104_v7, %v104_v7 }
  0xdb   :  { %v106_v11 = vpop.f32.mrf.mxu0  ;;  %111 = vadd.xlane.f32.xlu0 %v110_v9 }
  0xdc   :  { %v116_v13 = vsel %vm109_vm2, %v115_v10, 0.0 }
  0xdd   :  { %v414_v12 = vpop.f32.mrf.mxu0 }
  0xdf   :  { %117 = vadd.xlane.f32.xlu0 %v116_v13 }
 0x164   :  { %v112_v19 = vpop.xlane.xlu0 %111 }
 0x165   :  { %v114_v20 = vmul.f32 0.015625, %v112_v19 }
 0x167   :  { %v120_v22 = vmul.f32 %v114_v20, %v114_v20  ;;  %v123_v27 = vsub.f32 %v104_v7, %v114_v20 }
 0x168   :  { %v118_v21 = vpop.xlane.xlu0 %117 }
 0x169   :  { %v119_v23 = vmul.f32 0.015625, %v118_v21 }
 0x16b   :  { %v121_v24 = vsub.f32 %v119_v23, %v120_v22 }
 0x16d   :  { %v122_v25 = vmax.f32 %v121_v24, 0.0 }
 0x16f   :  { %v124_v26 = vadd.f32 1e-05, %v122_v25 }
 0x171   :  { %457 = vrsqrt.f32 %v124_v26 }
 0x17e   :  { %v458_v28 = vpop.eup %457 }
 0x17f   :  { %v126_v30 = vmul.f32 %v458_v28, %v123_v27 }
 0x181   :  { %v131_v32 = vmul.f32 %v377_v29, %v126_v30 }
 0x183   :  { %v136_v33 = vadd.f32 %v378_v31, %v131_v32 }
 0x185   :  { %459 = vtanh.f32 %v136_v33 }
 0x192   :  { %v460_v34 = vpop.eup %459 }
 0x193   :  { %v138_v35 = vpack.c.bf16 %v460_v34, %v460_v34 }
 0x195   :  { %424 = vmatmul.mubr.msk.bf16.vlgmr.msra.gmra.mxu1 %vm109_vm2, %v138_v35 }
 0x255   :  { %v212_v38 = vpop.f32.mrf.mxu1 }
 0x256   :  { %v213_v39 = vadd.f32 %v379_v37, %v212_v38 }
 0x257   :  { %v425_v40 = vpop.f32.mrf.mxu1 }
 0x258   :  { %v218_v41 = vmax.f32 %v213_v39, 0.0 }
 0x259   :  { %v215_v42 = vpop.f32.mrf.mxu1 }
 0x25a   :  { %v219_v44 = vpack.c.bf16 %v218_v41, %v218_v41 }
 0x25b   :  { %v426_v45 = vpop.f32.mrf.mxu1 }
 0x25c   :  { %432 = vmatmul.mubr.msk.bf16.vlgmr.msra.gmra.mxu0 %vm65_vm1, %v219_v44 }
 0x25d   :  { %436 = vmatpush3.bf16.msra.mxu0 %v455_v43  ;;  %439 = vmatprep.mubr.msk.bf16.mxu0 %vm509_vm0, %v508_v0 }
 0x25e   :  { %437 = vmatprep.subr.bf16.mxu0 %v508_v0  ;;  %v348_v0 = vlaneseq }
 0x260   :  { %v349_v1 = vand.u32 127, %v348_v0 }
 0x261   :  { %438 = vmatpush3.bf16.msra.mxu0 %v456_v46 }
 0x262   :  { %vm354_vm3 = vcmp.lt.s32.totalorder %v349_v1, 4 }
 0x31c   :  { %v277_v48 = vpop.f32.mrf.mxu0 }
 0x31d   :  { %v278_v49 = vadd.f32 %v385_v47, %v277_v48 }
 0x31e   :  { %v433_v50 = vpop.f32.mrf.mxu0 }
 0x31f   :  { %v283_v51 = vmax.f32 %v278_v49, 0.0 }
 0x320   :  { %v280_v52 = vpop.f32.mrf.mxu0 }
 0x321   :  { %v284_v53 = vpack.c.bf16 %v283_v51, %v283_v51 }
 0x322   :  { %v434_v54 = vpop.f32.mrf.mxu0 }
 0x323   :  { %440 = vmatmul.mubr.msk.bf16.vlgmr.msra.gmra.mxu0 %vm65_vm1, %v284_v53 }
 0x3e3   :  { %v342_v56 = vpop.f32.mrf.mxu0 }
 0x3e4   :  { %v343_v57 = vadd.f32 %v389_v55, %v342_v56 }
 0x3e5   :  { %v441_v58 = vpop.f32.mrf.mxu0 }
 0x3e6   :  { %v350_v59 = vmax.f32 %v343_v57, -10.0 }
 0x3e7   :  { %v345_v60 = vpop.f32.mrf.mxu0 }
 0x3e8   :  { %v351_v61 = vmin.f32 %v350_v59, 2.0 }
 0x3e9   :  { %v442_v62 = vpop.f32.mrf.mxu0 }
 0x3ea   :  { %v352_v63 = vmul.f32 1.442695, %v351_v61 }
 0x3ec   :  { %461 = vpow2.f32 %v352_v63 }
 0x3f9   :  { %v462_v2 = vpop.eup %461 }
 0x3fa   :  { %v355_v3 = vsel %vm354_vm3, %v343_v57, %v462_v2 }
 0x3fb   :  { %v356_v4 = vpack.c.bf16 %v355_v3, %v355_v3 }
 0x3fd   :  { %357 = vst [vmem:[#allocation5] sm:$0xf] %v356_v4 }
 0x3fe   :  { %494 = shalt.err (!%p491_p9)
}
 0x3ff   :  { %367 = dma.vmem_to_hbm [thread:$0]  %s365_s29, 64, %s630_s6, [#allocation4]  }
 0x400   :  { %505 = dma.done.wait [#allocation4], 64  }
 0x401   :  { %506 = vsyncadd [#allocation4], 4294967232 }
 0x402   :  { %371 = vsyncpa [#allocation3], 1 }
 0x403   :  { %372 = vsyncpa [#allocation4], 1 }

</bundles_post_ra>
